<compile_context>
chip_gen: v7x
topology: tpu7x:2x2x1
jax: 0.10.0
libtpu: 0.0.40
codegen_flags: <defaults>
</compile_context>

<pallas_src>
import functools

import jax
import jax.numpy as jnp
from jax.experimental import pallas as pl
from jax.experimental.pallas import tpu as pltpu

LANES = 128
SUB = 8                        # sublanes per f32 vreg
CHUNK_ROWS = 256               # inner-loop chunk: 256*128*4 B = 128 KiB per f32 temporary
MAX_BLOCK_ROWS_WIDE = 4096     # >=4-byte inputs: 2 MiB per input per grid step
MAX_BLOCK_ROWS_NARROW = 8192   # <=2-byte inputs: still 2 MiB per input per grid step
_VMEM_LIMIT = 32 * 1024 * 1024  # 2 inputs x 2 buffers x 2 MiB + temporaries, with headroom


def _tensorcores_per_chip():
    # Megacore chips (v4, v5p) and v7x expose 2 TensorCores behind one device; a leading
    # "parallel" grid axis lets Mosaic split the stream across them.  Single-TC chips
    # (v5e, v6e) get ncores=1 so there is no duplicate clamped block or extra bookkeeping.
    # TODO(synk): on v7x, verify in the Mosaic lowering that the "parallel" axis really
    # shards across both TCs; if not, switch that axis to pltpu.CORE_PARALLEL.
    try:
        kind = jax.devices()[0].device_kind.lower()
    except Exception:
        return 1
    if any(tag in kind for tag in ("v4", "v5p", "v7")):
        return 2
    return 1


def _dice_bce_kernel(x_ref, t_ref, part_ref, inter_acc, pt_acc, bce_acc, *,
                     total, block_rows, chunk_rows, blocks_per_core):
    c = pl.program_id(0)                  # core-split axis ("parallel")
    j = pl.program_id(1)                  # streaming axis ("arbitrary")
    block_elems = block_rows * LANES
    full_blocks = total // block_elems    # blocks containing no invalid element at all
    n_chunks = block_rows // chunk_rows
    n_sub = chunk_rows // SUB

    @pl.when(j == 0)
    def _init():
        inter_acc[...] = jnp.zeros_like(inter_acc)
        pt_acc[...] = jnp.zeros_like(pt_acc)
        bce_acc[...] = jnp.zeros_like(bce_acc)

    b = c * blocks_per_core + j           # logical block id over the whole stream

    def _fold(v):                         # (chunk_rows, 128) -> (8, 128): pure VPU adds
        return jnp.sum(v.reshape(n_sub, SUB, LANES), axis=0)

    def _elementwise(x, t):
        # sigmoid + BCE from one exp(-|x|), one EUP reciprocal and one log1p.
        e = jnp.exp(-jnp.abs(x))
        r = pl.reciprocal(1.0 + e, approx=True)      # EUP slot, no Newton VALU steps
        p = jnp.where(x >= 0.0, r, e * r)            # sigmoid(x)
        l1pe = jnp.log1p(e)
        nl1mp = jnp.maximum(x, 0.0) + l1pe           # -log(1 - p)
        nlp = nl1mp - x                              # -log(p)
        u = jnp.minimum(nl1mp, 100.0)                # torch's -100 log clamp
        v = jnp.minimum(nlp, 100.0)
        bce = u + t * (v - u)                        # (1 - t) * u + t * v
        return p, bce

    def _block_sums(masked):
        def chunk_body(ci, carry):
            a_i, a_pt, a_b = carry
            r0 = pl.multiple_of(ci * chunk_rows, chunk_rows)
            x = x_ref[pl.ds(r0, chunk_rows), :].astype(jnp.float32)
            t = t_ref[pl.ds(r0, chunk_rows), :].astype(jnp.float32)
            p, bce = _elementwise(x, t)
            pt, ps = p * t, p + t
            if masked:
                lidx = (b * block_elems + r0 * LANES
                        + jax.lax.broadcasted_iota(jnp.int32, (chunk_rows, LANES), 0) * LANES
                        + jax.lax.broadcasted_iota(jnp.int32, (chunk_rows, LANES), 1))
                m = lidx < total               # int32: total asserted < 2**31 in wrapper
                pt = jnp.where(m, pt, 0.0)     # select (never multiply-by-mask): safe vs NaN
                ps = jnp.where(m, ps, 0.0)
                bce = jnp.where(m, bce, 0.0)
            return a_i + _fold(pt), a_pt + _fold(ps), a_b + _fold(bce)

        zeros = jnp.zeros((SUB, LANES), jnp.float32)
        return jax.lax.fori_loop(0, n_chunks, chunk_body, (zeros, zeros, zeros),
                                 unroll=2 if n_chunks > 1 else 1)

    @pl.when(b < full_blocks)
    def _interior():                       # fast path: no iota / select work at all
        a_i, a_pt, a_b = _block_sums(masked=False)
        inter_acc[...] += a_i
        pt_acc[...] += a_pt
        bce_acc[...] += a_b

    @pl.when(b >= full_blocks)
    def _tail():                           # ragged / partially-OOB / clamped duplicate blocks
        a_i, a_pt, a_b = _block_sums(masked=True)
        inter_acc[...] += a_i
        pt_acc[...] += a_pt
        bce_acc[...] += a_b

    @pl.when(j == pl.num_programs(1) - 1)
    def _finalize():
        part_ref[0, 0] = inter_acc[...]
        part_ref[0, 1] = pt_acc[...]
        part_ref[0, 2] = bce_acc[...]


def dice_bce_loss(inputs, targets, smooth=1.0):
    """Pallas TPU implementation of DICEBCELoss.forward (sigmoid + dice + mean BCE)."""
    total = int(inputs.size)
    assert int(targets.size) == total
    # Tail mask uses int32 linear indices (with clamped-step margin).
    assert total < 2**31 - 16 * MAX_BLOCK_ROWS_NARROW * LANES

    x = inputs.reshape(-1)    # stream native dtypes; pass bf16 logits / targets upstream
    t = targets.reshape(-1)   # to halve HBM traffic — the f32 upcast happens in-kernel.

    # Lane-dense (rows, 128) view.  Copy-free whenever numel % 128 == 0 (ragged rows are
    # masked in-kernel on the partially out-of-bounds boundary block).  Only numel % 128
    # != 0 (or numel < 1024) still needs a host-side pad of the flat arrays.
    padded_total = max(pl.cdiv(total, LANES) * LANES, SUB * LANES)
    if padded_total != total:
        x = jnp.pad(x, (0, padded_total - total))
        t = jnp.pad(t, (0, padded_total - total))
    rows = padded_total // LANES
    x2d = x.reshape(rows, LANES)
    t2d = t.reshape(rows, LANES)

    itemsize = max(jnp.dtype(x2d.dtype).itemsize, jnp.dtype(t2d.dtype).itemsize)
    max_rows = MAX_BLOCK_ROWS_NARROW if itemsize <= 2 else MAX_BLOCK_ROWS_WIDE
    block_rows = min(max_rows, (rows // SUB) * SUB)        # multiple of 8, <= rows
    chunk_rows = min(CHUNK_ROWS, block_rows)
    block_rows = (block_rows // chunk_rows) * chunk_rows   # multiple of chunk_rows
    num_blocks = pl.cdiv(rows, block_rows)

    ncores = max(1, min(_tensorcores_per_chip(), num_blocks))
    blocks_per_core = pl.cdiv(num_blocks, ncores)

    def in_map(c, j):
        # Clamp so steps past the end (core-count rounding) stay in bounds; their
        # contribution is zeroed by the in-kernel mask.
        return (jnp.minimum(c * blocks_per_core + j, num_blocks - 1), 0)

    kernel = functools.partial(_dice_bce_kernel, total=total, block_rows=block_rows,
                               chunk_rows=chunk_rows, blocks_per_core=blocks_per_core)

    parts = pl.pallas_call(
        kernel,
        out_shape=jax.ShapeDtypeStruct((ncores, 3, SUB, LANES), jnp.float32),
        grid_spec=pltpu.PrefetchScalarGridSpec(
            num_scalar_prefetch=0,
            grid=(ncores, blocks_per_core),
            in_specs=[
                pl.BlockSpec((block_rows, LANES), in_map),
                pl.BlockSpec((block_rows, LANES), in_map),
            ],
            out_specs=pl.BlockSpec((1, 3, SUB, LANES), lambda c, j: (c, 0, 0, 0)),
            scratch_shapes=[
                pltpu.VMEM((SUB, LANES), jnp.float32),   # sum(p * t)
                pltpu.VMEM((SUB, LANES), jnp.float32),   # sum(p + t)
                pltpu.VMEM((SUB, LANES), jnp.float32),   # sum(bce)
            ],
        ),
        compiler_params=pltpu.CompilerParams(
            dimension_semantics=("parallel", "arbitrary"),
            vmem_limit_bytes=_VMEM_LIMIT),
    )(x2d, t2d)

    sums = jnp.sum(parts, axis=(0, 2, 3))          # tiny final cross-lane reduce: (3,)
    inter, p_plus_t, bce_sum = sums[0], sums[1], sums[2]
    smooth = jnp.float32(smooth)
    dice = 1.0 - (2.0 * inter + smooth) / (p_plus_t + smooth)
    bce_mean = bce_sum / jnp.float32(total)
    return bce_mean + dice


def _reference_loss(inputs, targets, smooth=1.0):
    # Faithful to torch: sigmoid -> dice + binary_cross_entropy(mean, log clamp -100).
    p = jax.nn.sigmoid(inputs.astype(jnp.float32)).reshape(-1)
    t = targets.reshape(-1).astype(jnp.float32)
    inter = jnp.sum(p * t)
    dice = 1.0 - (2.0 * inter + smooth) / (jnp.sum(p) + jnp.sum(t) + smooth)
    log_p = jnp.maximum(jnp.log(p), -100.0)
    log_1mp = jnp.maximum(jnp.log1p(-p), -100.0)
    bce = jnp.mean(-(t * log_p + (1.0 - t) * log_1mp))
    return bce + dice


if __name__ == "__main__":
    key = jax.random.PRNGKey(0)
    k1, k2, k3, k4 = jax.random.split(key, 4)

    # Case 1: NCHW logits (f32) + bf16 0/1 mask (narrow target stream), 1024-aligned numel.
    x1 = jax.random.normal(k1, (2, 4, 16, 16), dtype=jnp.float32)
    t1 = (jax.random.uniform(k2, (2, 4, 16, 16)) > 0.5).astype(jnp.bfloat16)
    loss1 = jax.block_until_ready(dice_bce_loss(x1, t1, smooth=1.0))
    ref1 = jax.block_until_ready(_reference_loss(x1, t1, smooth=1.0))
    assert jnp.allclose(loss1, ref1, atol=2e-3, rtol=2e-3), (loss1, ref1)

    # Case 2: unaligned numel (2*3*20*20 = 2400) exercising the lane pad + masked
    # out-of-bounds boundary block + multi-block streaming paths, with f32 targets.
    x2 = 2.5 * jax.random.normal(k3, (2, 3, 20, 20), dtype=jnp.float32)
    t2 = (jax.random.uniform(k4, (2, 3, 20, 20)) > 0.5).astype(jnp.float32)
    loss2 = jax.block_until_ready(dice_bce_loss(x2, t2, smooth=1.0))
    ref2 = jax.block_until_ready(_reference_loss(x2, t2, smooth=1.0))
    assert jnp.allclose(loss2, ref2, atol=2e-3, rtol=2e-3), (loss2, ref2)

    print("KERNEL_OK")
</pallas_src>

<mosaic_0001>
module attributes {stable_mosaic.version = 11 : i64} {
  func.func @_dice_bce_kernel(%arg0: i32, %arg1: i32, %arg2: memref<16x128xf32, #tpu.memory_space<vmem>>, %arg3: memref<16x128xbf16, #tpu.memory_space<vmem>>, %arg4: memref<1x3x8x128xf32, #tpu.memory_space<vmem>>, %arg5: memref<8x128xf32, #tpu.memory_space<vmem>>, %arg6: memref<8x128xf32, #tpu.memory_space<vmem>>, %arg7: memref<8x128xf32, #tpu.memory_space<vmem>>) attributes {dimension_semantics = [#tpu.dimension_semantics<parallel>, #tpu.dimension_semantics<arbitrary>], iteration_bounds = array<i64: 1, 1>, scalar_prefetch = 0 : i64, scratch_operands = 3 : i64, tpu.core_type = #tpu.core_type<tc>, window_params = [{transform_indices = @transform_0, window_bounds = array<i64: 16, 128>}, {transform_indices = @transform_1, window_bounds = array<i64: 16, 128>}, {transform_indices = @transform_2, window_bounds = array<i64: 1, 3, 8, 128>}]} {
    %c0_i32 = arith.constant 0 : i32
    %0 = arith.cmpi eq, %arg1, %c0_i32 : i32
    %1 = arith.extui %0 : i1 to i32
    %c0_i32_0 = arith.constant 0 : i32
    %2 = arith.cmpi ne, %1, %c0_i32_0 : i32
    scf.if %2 {
      %cst = arith.constant 0.000000e+00 : f32
      %14 = vector.broadcast %cst : f32 to vector<8x128xf32>
      %c0 = arith.constant 0 : index
      %c0_7 = arith.constant 0 : index
      %15 = vector.load %arg5[%c0, %c0_7] : memref<8x128xf32, #tpu.memory_space<vmem>>, vector<8x128xf32>
      tpu.vector_store %arg5[%c0, %c0_7], %14 {strides = array<i32>} : memref<8x128xf32, #tpu.memory_space<vmem>>, vector<8x128xf32>,
      %cst_8 = arith.constant 0.000000e+00 : f32
      %16 = vector.broadcast %cst_8 : f32 to vector<8x128xf32>
      %c0_9 = arith.constant 0 : index
      %c0_10 = arith.constant 0 : index
      %17 = vector.load %arg6[%c0_9, %c0_10] : memref<8x128xf32, #tpu.memory_space<vmem>>, vector<8x128xf32>
      tpu.vector_store %arg6[%c0_9, %c0_10], %16 {strides = array<i32>} : memref<8x128xf32, #tpu.memory_space<vmem>>, vector<8x128xf32>,
      %cst_11 = arith.constant 0.000000e+00 : f32
      %18 = vector.broadcast %cst_11 : f32 to vector<8x128xf32>
      %c0_12 = arith.constant 0 : index
      %c0_13 = arith.constant 0 : index
      %19 = vector.load %arg7[%c0_12, %c0_13] : memref<8x128xf32, #tpu.memory_space<vmem>>, vector<8x128xf32>
      tpu.vector_store %arg7[%c0_12, %c0_13], %18 {strides = array<i32>} : memref<8x128xf32, #tpu.memory_space<vmem>>, vector<8x128xf32>,
    } else {
    }
    %c1_i32 = arith.constant 1 : i32
    %3 = arith.muli %arg0, %c1_i32 : i32
    %4 = arith.addi %3, %arg1 : i32
    %c1_i32_1 = arith.constant 1 : i32
    %5 = arith.cmpi slt, %4, %c1_i32_1 : i32
    %6 = arith.extui %5 : i1 to i32
    %c0_i32_2 = arith.constant 0 : i32
    %7 = arith.cmpi ne, %6, %c0_i32_2 : i32
    scf.if %7 {
      %cst = arith.constant 0.000000e+00 : f32
      %14 = vector.broadcast %cst : f32 to vector<8x128xf32>
      %c0_i32_7 = arith.constant 0 : i32
      %c16_i32 = arith.constant 16 : i32
      %15 = arith.muli %c0_i32_7, %c16_i32 : i32
      %16 = tpu.assume_multiple %15, 16 : i32
      %17 = arith.index_cast %16 : i32 to index
      %c0 = arith.constant 0 : index
      %18 = vector.load %arg2[%17, %c0] : memref<16x128xf32, #tpu.memory_space<vmem>>, vector<16x128xf32>
      %19 = arith.index_cast %16 : i32 to index
      %c0_8 = arith.constant 0 : index
      %20 = vector.load %arg3[%19, %c0_8] : memref<16x128xbf16, #tpu.memory_space<vmem>>, vector<16x128xbf16>
      %21 = arith.extf %20 : vector<16x128xbf16> to vector<16x128xf32>
      %22 = math.absf %18 : vector<16x128xf32>
      %cst_9 = arith.constant 0.000000e+00 : f32
      %23 = vector.broadcast %cst_9 : f32 to vector<16x128xf32>
      %24 = arith.subf %23, %22 : vector<16x128xf32>
      %25 = math.exp %24 : vector<16x128xf32>
      %cst_10 = arith.constant 1.000000e+00 : f32
      %26 = vector.broadcast %cst_10 : f32 to vector<16x128xf32>
      %27 = arith.addf %26, %25 : vector<16x128xf32>
      %28 = tpu.reciprocal %27 {approx = true} : vector<16x128xf32> -> vector<16x128xf32>
      %cst_11 = arith.constant 0.000000e+00 : f32
      %29 = vector.broadcast %cst_11 : f32 to vector<16x128xf32>
      %30 = arith.cmpf oge, %18, %29 : vector<16x128xf32>
      %31 = arith.mulf %25, %28 : vector<16x128xf32>
      %32 = arith.select %30, %28, %31 : vector<16x128xi1>, vector<16x128xf32>
      %33 = math.log1p %25 : vector<16x128xf32>
      %cst_12 = arith.constant 0.000000e+00 : f32
      %34 = vector.broadcast %cst_12 : f32 to vector<16x128xf32>
      %35 = arith.maximumf %18, %34 : vector<16x128xf32>
      %36 = arith.addf %35, %33 : vector<16x128xf32>
      %37 = arith.subf %36, %18 : vector<16x128xf32>
      %cst_13 = arith.constant 1.000000e+02 : f32
      %38 = vector.broadcast %cst_13 : f32 to vector<16x128xf32>
      %39 = arith.minimumf %36, %38 : vector<16x128xf32>
      %cst_14 = arith.constant 1.000000e+02 : f32
      %40 = vector.broadcast %cst_14 : f32 to vector<16x128xf32>
      %41 = arith.minimumf %37, %40 : vector<16x128xf32>
      %42 = arith.subf %41, %39 : vector<16x128xf32>
      %43 = arith.mulf %21, %42 : vector<16x128xf32>
      %44 = arith.addf %39, %43 : vector<16x128xf32>
      %45 = arith.mulf %32, %21 : vector<16x128xf32>
      %46 = arith.addf %32, %21 : vector<16x128xf32>
      %47 = vector.shape_cast %45 : vector<16x128xf32> to vector<2x8x128xf32>
      %cst_15 = arith.constant dense<0.000000e+00> : vector<8x128xf32>
      %48 = vector.multi_reduction <add>, %47, %cst_15 [0] : vector<2x8x128xf32> to vector<8x128xf32>
      %49 = arith.addf %14, %48 : vector<8x128xf32>
      %50 = vector.shape_cast %46 : vector<16x128xf32> to vector<2x8x128xf32>
      %cst_16 = arith.constant dense<0.000000e+00> : vector<8x128xf32>
      %51 = vector.multi_reduction <add>, %50, %cst_16 [0] : vector<2x8x128xf32> to vector<8x128xf32>
      %52 = arith.addf %14, %51 : vector<8x128xf32>
      %53 = vector.shape_cast %44 : vector<16x128xf32> to vector<2x8x128xf32>
      %cst_17 = arith.constant dense<0.000000e+00> : vector<8x128xf32>
      %54 = vector.multi_reduction <add>, %53, %cst_17 [0] : vector<2x8x128xf32> to vector<8x128xf32>
      %55 = arith.addf %14, %54 : vector<8x128xf32>
      %c1_i32_18 = arith.constant 1 : i32
      %c0_19 = arith.constant 0 : index
      %c0_20 = arith.constant 0 : index
      %56 = vector.load %arg5[%c0_19, %c0_20] : memref<8x128xf32, #tpu.memory_space<vmem>>, vector<8x128xf32>
      %57 = arith.addf %56, %49 : vector<8x128xf32>
      %c0_21 = arith.constant 0 : index
      %c0_22 = arith.constant 0 : index
      %58 = vector.load %arg5[%c0_21, %c0_22] : memref<8x128xf32, #tpu.memory_space<vmem>>, vector<8x128xf32>
      tpu.vector_store %arg5[%c0_21, %c0_22], %57 {strides = array<i32>} : memref<8x128xf32, #tpu.memory_space<vmem>>, vector<8x128xf32>,
      %c0_23 = arith.constant 0 : index
      %c0_24 = arith.constant 0 : index
      %59 = vector.load %arg6[%c0_23, %c0_24] : memref<8x128xf32, #tpu.memory_space<vmem>>, vector<8x128xf32>
      %60 = arith.addf %59, %52 : vector<8x128xf32>
      %c0_25 = arith.constant 0 : index
      %c0_26 = arith.constant 0 : index
      %61 = vector.load %arg6[%c0_25, %c0_26] : memref<8x128xf32, #tpu.memory_space<vmem>>, vector<8x128xf32>
      tpu.vector_store %arg6[%c0_25, %c0_26], %60 {strides = array<i32>} : memref<8x128xf32, #tpu.memory_space<vmem>>, vector<8x128xf32>,
      %c0_27 = arith.constant 0 : index
      %c0_28 = arith.constant 0 : index
      %62 = vector.load %arg7[%c0_27, %c0_28] : memref<8x128xf32, #tpu.memory_space<vmem>>, vector<8x128xf32>
      %63 = arith.addf %62, %55 : vector<8x128xf32>
      %c0_29 = arith.constant 0 : index
      %c0_30 = arith.constant 0 : index
      %64 = vector.load %arg7[%c0_29, %c0_30] : memref<8x128xf32, #tpu.memory_space<vmem>>, vector<8x128xf32>
      tpu.vector_store %arg7[%c0_29, %c0_30], %63 {strides = array<i32>} : memref<8x128xf32, #tpu.memory_space<vmem>>, vector<8x128xf32>,
    } else {
    }
    %c1_i32_3 = arith.constant 1 : i32
    %8 = arith.cmpi sge, %4, %c1_i32_3 : i32
    %9 = arith.extui %8 : i1 to i32
    %c0_i32_4 = arith.constant 0 : i32
    %10 = arith.cmpi ne, %9, %c0_i32_4 : i32
    scf.if %10 {
      %cst = arith.constant 0.000000e+00 : f32
      %14 = vector.broadcast %cst : f32 to vector<8x128xf32>
      %c0_i32_7 = arith.constant 0 : i32
      %c16_i32 = arith.constant 16 : i32
      %15 = arith.muli %c0_i32_7, %c16_i32 : i32
      %16 = tpu.assume_multiple %15, 16 : i32
      %17 = arith.index_cast %16 : i32 to index
      %c0 = arith.constant 0 : index
      %18 = vector.load %arg2[%17, %c0] : memref<16x128xf32, #tpu.memory_space<vmem>>, vector<16x128xf32>
      %19 = arith.index_cast %16 : i32 to index
      %c0_8 = arith.constant 0 : index
      %20 = vector.load %arg3[%19, %c0_8] : memref<16x128xbf16, #tpu.memory_space<vmem>>, vector<16x128xbf16>
      %21 = arith.extf %20 : vector<16x128xbf16> to vector<16x128xf32>
      %22 = math.absf %18 : vector<16x128xf32>
      %cst_9 = arith.constant 0.000000e+00 : f32
      %23 = vector.broadcast %cst_9 : f32 to vector<16x128xf32>
      %24 = arith.subf %23, %22 : vector<16x128xf32>
      %25 = math.exp %24 : vector<16x128xf32>
      %cst_10 = arith.constant 1.000000e+00 : f32
      %26 = vector.broadcast %cst_10 : f32 to vector<16x128xf32>
      %27 = arith.addf %26, %25 : vector<16x128xf32>
      %28 = tpu.reciprocal %27 {approx = true} : vector<16x128xf32> -> vector<16x128xf32>
      %cst_11 = arith.constant 0.000000e+00 : f32
      %29 = vector.broadcast %cst_11 : f32 to vector<16x128xf32>
      %30 = arith.cmpf oge, %18, %29 : vector<16x128xf32>
      %31 = arith.mulf %25, %28 : vector<16x128xf32>
      %32 = arith.select %30, %28, %31 : vector<16x128xi1>, vector<16x128xf32>
      %33 = math.log1p %25 : vector<16x128xf32>
      %cst_12 = arith.constant 0.000000e+00 : f32
      %34 = vector.broadcast %cst_12 : f32 to vector<16x128xf32>
      %35 = arith.maximumf %18, %34 : vector<16x128xf32>
      %36 = arith.addf %35, %33 : vector<16x128xf32>
      %37 = arith.subf %36, %18 : vector<16x128xf32>
      %cst_13 = arith.constant 1.000000e+02 : f32
      %38 = vector.broadcast %cst_13 : f32 to vector<16x128xf32>
      %39 = arith.minimumf %36, %38 : vector<16x128xf32>
      %cst_14 = arith.constant 1.000000e+02 : f32
      %40 = vector.broadcast %cst_14 : f32 to vector<16x128xf32>
      %41 = arith.minimumf %37, %40 : vector<16x128xf32>
      %42 = arith.subf %41, %39 : vector<16x128xf32>
      %43 = arith.mulf %21, %42 : vector<16x128xf32>
      %44 = arith.addf %39, %43 : vector<16x128xf32>
      %45 = arith.mulf %32, %21 : vector<16x128xf32>
      %46 = arith.addf %32, %21 : vector<16x128xf32>
      %c2048_i32 = arith.constant 2048 : i32
      %47 = arith.muli %4, %c2048_i32 : i32
      %c128_i32 = arith.constant 128 : i32
      %48 = arith.muli %16, %c128_i32 : i32
      %49 = arith.addi %47, %48 : i32
      %50 = tpu.iota {dimensions = array<i32: 0>} : vector<16x128xi32>
      %c128_i32_15 = arith.constant 128 : i32
      %51 = vector.broadcast %c128_i32_15 : i32 to vector<16x128xi32>
      %52 = arith.muli %50, %51 : vector<16x128xi32>
      %53 = vector.broadcast %49 : i32 to vector<16x128xi32>
      %54 = arith.addi %53, %52 : vector<16x128xi32>
      %55 = tpu.iota {dimensions = array<i32: 1>} : vector<16x128xi32>
      %56 = arith.addi %54, %55 : vector<16x128xi32>
      %c2048_i32_16 = arith.constant 2048 : i32
      %57 = vector.broadcast %c2048_i32_16 : i32 to vector<16x128xi32>
      %58 = arith.cmpi slt, %56, %57 : vector<16x128xi32>
      %cst_17 = arith.constant 0.000000e+00 : f32
      %59 = vector.broadcast %cst_17 : f32 to vector<16x128xf32>
      %60 = arith.select %58, %45, %59 : vector<16x128xi1>, vector<16x128xf32>
      %cst_18 = arith.constant 0.000000e+00 : f32
      %61 = vector.broadcast %cst_18 : f32 to vector<16x128xf32>
      %62 = arith.select %58, %46, %61 : vector<16x128xi1>, vector<16x128xf32>
      %cst_19 = arith.constant 0.000000e+00 : f32
      %63 = vector.broadcast %cst_19 : f32 to vector<16x128xf32>
      %64 = arith.select %58, %44, %63 : vector<16x128xi1>, vector<16x128xf32>
      %65 = vector.shape_cast %60 : vector<16x128xf32> to vector<2x8x128xf32>
      %cst_20 = arith.constant dense<0.000000e+00> : vector<8x128xf32>
      %66 = vector.multi_reduction <add>, %65, %cst_20 [0] : vector<2x8x128xf32> to vector<8x128xf32>
      %67 = arith.addf %14, %66 : vector<8x128xf32>
      %68 = vector.shape_cast %62 : vector<16x128xf32> to vector<2x8x128xf32>
      %cst_21 = arith.constant dense<0.000000e+00> : vector<8x128xf32>
      %69 = vector.multi_reduction <add>, %68, %cst_21 [0] : vector<2x8x128xf32> to vector<8x128xf32>
      %70 = arith.addf %14, %69 : vector<8x128xf32>
      %71 = vector.shape_cast %64 : vector<16x128xf32> to vector<2x8x128xf32>
      %cst_22 = arith.constant dense<0.000000e+00> : vector<8x128xf32>
      %72 = vector.multi_reduction <add>, %71, %cst_22 [0] : vector<2x8x128xf32> to vector<8x128xf32>
      %73 = arith.addf %14, %72 : vector<8x128xf32>
      %c1_i32_23 = arith.constant 1 : i32
      %c0_24 = arith.constant 0 : index
      %c0_25 = arith.constant 0 : index
      %74 = vector.load %arg5[%c0_24, %c0_25] : memref<8x128xf32, #tpu.memory_space<vmem>>, vector<8x128xf32>
      %75 = arith.addf %74, %67 : vector<8x128xf32>
      %c0_26 = arith.constant 0 : index
      %c0_27 = arith.constant 0 : index
      %76 = vector.load %arg5[%c0_26, %c0_27] : memref<8x128xf32, #tpu.memory_space<vmem>>, vector<8x128xf32>
      tpu.vector_store %arg5[%c0_26, %c0_27], %75 {strides = array<i32>} : memref<8x128xf32, #tpu.memory_space<vmem>>, vector<8x128xf32>,
      %c0_28 = arith.constant 0 : index
      %c0_29 = arith.constant 0 : index
      %77 = vector.load %arg6[%c0_28, %c0_29] : memref<8x128xf32, #tpu.memory_space<vmem>>, vector<8x128xf32>
      %78 = arith.addf %77, %70 : vector<8x128xf32>
      %c0_30 = arith.constant 0 : index
      %c0_31 = arith.constant 0 : index
      %79 = vector.load %arg6[%c0_30, %c0_31] : memref<8x128xf32, #tpu.memory_space<vmem>>, vector<8x128xf32>
      tpu.vector_store %arg6[%c0_30, %c0_31], %78 {strides = array<i32>} : memref<8x128xf32, #tpu.memory_space<vmem>>, vector<8x128xf32>,
      %c0_32 = arith.constant 0 : index
      %c0_33 = arith.constant 0 : index
      %80 = vector.load %arg7[%c0_32, %c0_33] : memref<8x128xf32, #tpu.memory_space<vmem>>, vector<8x128xf32>
      %81 = arith.addf %80, %73 : vector<8x128xf32>
      %c0_34 = arith.constant 0 : index
      %c0_35 = arith.constant 0 : index
      %82 = vector.load %arg7[%c0_34, %c0_35] : memref<8x128xf32, #tpu.memory_space<vmem>>, vector<8x128xf32>
      tpu.vector_store %arg7[%c0_34, %c0_35], %81 {strides = array<i32>} : memref<8x128xf32, #tpu.memory_space<vmem>>, vector<8x128xf32>,
    } else {
    }
    %c0_i32_5 = arith.constant 0 : i32
    %11 = arith.cmpi eq, %arg1, %c0_i32_5 : i32
    %12 = arith.extui %11 : i1 to i32
    %c0_i32_6 = arith.constant 0 : i32
    %13 = arith.cmpi ne, %12, %c0_i32_6 : i32
    scf.if %13 {
      %c0 = arith.constant 0 : index
      %c0_7 = arith.constant 0 : index
      %14 = vector.load %arg5[%c0, %c0_7] : memref<8x128xf32, #tpu.memory_space<vmem>>, vector<8x128xf32>
      %c0_8 = arith.constant 0 : index
      %c0_9 = arith.constant 0 : index
      %c0_10 = arith.constant 0 : index
      %c0_11 = arith.constant 0 : index
      %15 = vector.load %arg4[%c0_8, %c0_9, %c0_10, %c0_11] : memref<1x3x8x128xf32, #tpu.memory_space<vmem>>, vector<1x1x8x128xf32>
      %16 = vector.shape_cast %15 : vector<1x1x8x128xf32> to vector<8x128xf32>
      %17 = vector.shape_cast %14 : vector<8x128xf32> to vector<1x1x8x128xf32>
      tpu.vector_store %arg4[%c0_8, %c0_9, %c0_10, %c0_11], %17 {strides = array<i32>} : memref<1x3x8x128xf32, #tpu.memory_space<vmem>>, vector<1x1x8x128xf32>,
      %c0_12 = arith.constant 0 : index
      %c0_13 = arith.constant 0 : index
      %18 = vector.load %arg6[%c0_12, %c0_13] : memref<8x128xf32, #tpu.memory_space<vmem>>, vector<8x128xf32>
      %c0_14 = arith.constant 0 : index
      %c1 = arith.constant 1 : index
      %c0_15 = arith.constant 0 : index
      %c0_16 = arith.constant 0 : index
      %19 = vector.load %arg4[%c0_14, %c1, %c0_15, %c0_16] : memref<1x3x8x128xf32, #tpu.memory_space<vmem>>, vector<1x1x8x128xf32>
      %20 = vector.shape_cast %19 : vector<1x1x8x128xf32> to vector<8x128xf32>
      %21 = vector.shape_cast %18 : vector<8x128xf32> to vector<1x1x8x128xf32>
      tpu.vector_store %arg4[%c0_14, %c1, %c0_15, %c0_16], %21 {strides = array<i32>} : memref<1x3x8x128xf32, #tpu.memory_space<vmem>>, vector<1x1x8x128xf32>,
      %c0_17 = arith.constant 0 : index
      %c0_18 = arith.constant 0 : index
      %22 = vector.load %arg7[%c0_17, %c0_18] : memref<8x128xf32, #tpu.memory_space<vmem>>, vector<8x128xf32>
      %c0_19 = arith.constant 0 : index
      %c2 = arith.constant 2 : index
      %c0_20 = arith.constant 0 : index
      %c0_21 = arith.constant 0 : index
      %23 = vector.load %arg4[%c0_19, %c2, %c0_20, %c0_21] : memref<1x3x8x128xf32, #tpu.memory_space<vmem>>, vector<1x1x8x128xf32>
      %24 = vector.shape_cast %23 : vector<1x1x8x128xf32> to vector<8x128xf32>
      %25 = vector.shape_cast %22 : vector<8x128xf32> to vector<1x1x8x128xf32>
      tpu.vector_store %arg4[%c0_19, %c2, %c0_20, %c0_21], %25 {strides = array<i32>} : memref<1x3x8x128xf32, #tpu.memory_space<vmem>>, vector<1x1x8x128xf32>,
    } else {
    }
    return
  }
  func.func @transform_0(%arg0: i32, %arg1: i32) -> (i32, i32) {
    %c1_i32 = arith.constant 1 : i32
    %0 = arith.muli %arg0, %c1_i32 : i32
    %1 = arith.addi %0, %arg1 : i32
    %c0_i32 = arith.constant 0 : i32
    %2 = arith.minsi %1, %c0_i32 : i32
    %c0_i32_0 = arith.constant 0 : i32
    %c0_i32_1 = arith.constant 0 : i32
    return %2, %c0_i32_0 : i32, i32
  }
  func.func @transform_1(%arg0: i32, %arg1: i32) -> (i32, i32) {
    %c1_i32 = arith.constant 1 : i32
    %0 = arith.muli %arg0, %c1_i32 : i32
    %1 = arith.addi %0, %arg1 : i32
    %c0_i32 = arith.constant 0 : i32
    %2 = arith.minsi %1, %c0_i32 : i32
    %c0_i32_0 = arith.constant 0 : i32
    %c0_i32_1 = arith.constant 0 : i32
    return %2, %c0_i32_0 : i32, i32
  }
  func.func @transform_2(%arg0: i32, %arg1: i32) -> (i32, i32, i32, i32) {
    %c0_i32 = arith.constant 0 : i32
    %c0_i32_0 = arith.constant 0 : i32
    %c0_i32_1 = arith.constant 0 : i32
    %c0_i32_2 = arith.constant 0 : i32
    return %arg0, %c0_i32, %c0_i32_0, %c0_i32_1 : i32, i32, i32, i32
  }
}

</mosaic_0001>

<bundles_post_ra>
// kernel: tpu_custom_call.1
= control target key start
LH: loop header
LB: loop body
LE: loop exit
PB: predicated region body
PF: predicated region fallthrough
CT: control target
= control target key end

     0   :  { %7 = vsyncpa [#allocation6], 0  ;;  %s451_s0 = inlined_call_operand.hbm [shape: f32[16,128], index: 0, kind: input, shape index: {}]   ;;  %s452_s1 = inlined_call_operand.hbm [shape: bf16[16,128], index: 1, kind: input, shape index: {}]   ;;  %s453_s2 = inlined_call_operand.hbm [shape: f32[1,3,8,128], index: 2, kind: output, shape index: {}]  }
   0x1   :  { %8 = vsyncpa [#allocation9], 0 }
   0x2   :  { %9 = vsyncpa [#allocation7], 0  ;;  %s381_s9 = smov [#allocation5]   ;;  %s309_s13 = scalar_lea.hbm %s451_s0, 256 }
   0x3   :  { %s21_s10 = sshll.u32 %s381_s9, 4  ;;  %p310_p0 = scmp.ne.s32.totalorder %s451_s0, %s309_s13  ;;  %s22_s10 = int_to_ptr.vmem [resolvable:$true] %s21_s10 }
   0x4   :  { %p313_p1 = scmp.lt.u32.totalorder %s309_s13, %s451_s0 }
   0x6   :  { %p315_p2 = pnand %p313_p1, %p310_p0 }
   0x8   :  { %318 = shalt.err (!%p315_p2)
}
   0x9   :  { %s319_s18 = scalar_lea.vmem %s22_s10, 256  ;;  %p324_p4 = scmp.lt.s32.totalorder %s22_s10, %s22_s10 }
   0xa   :  { %p320_p3 = scmp.ne.s32.totalorder %s22_s10, %s319_s18  ;;  %p325_p5 = scmp.lt.s32.totalorder %s319_s18, %s319_s18 }
   0xc   :  { %p326_p6 = por %p325_p5, %p324_p4 }
   0xe   :  { %p327_p7 = pnand %p326_p6, %p320_p3 }
  0x10   :  { %330 = shalt.err (!%p327_p7)
}
  0x11   :  { %s382_s19 = smov 128   ;;  %s383_s20 = smov 8  }
  0x12   :  { %27 = dma.hbm_to_vmem [thread:$0]  %s451_s0, 256, %s22_s10, [#allocation6], %s382_s19, %s382_s19, %s383_s20  }
  0x13   :  { %s384_s23 = smov [#allocation8]   ;;  %s331_s27 = scalar_lea.hbm %s452_s1, 128 }
  0x14   :  { %s39_s24 = sshll.u32 %s384_s23, 4  ;;  %p332_p8 = scmp.ne.s32.totalorder %s452_s1, %s331_s27  ;;  %s40_s24 = int_to_ptr.vmem [resolvable:$true] %s39_s24 }
  0x15   :  { %p335_p9 = scmp.lt.u32.totalorder %s331_s27, %s452_s1 }
  0x17   :  { %p337_p10 = pnand %p335_p9, %p332_p8 }
  0x19   :  { %340 = shalt.err (!%p337_p10)
}
  0x1a   :  { %s341_s4 = scalar_lea.vmem %s40_s24, 128  ;;  %p346_p12 = scmp.lt.s32.totalorder %s40_s24, %s40_s24 }
  0x1b   :  { %p342_p11 = scmp.ne.s32.totalorder %s40_s24, %s341_s4  ;;  %p347_p13 = scmp.lt.s32.totalorder %s341_s4, %s341_s4 }
  0x1d   :  { %p348_p0 = por %p347_p13, %p346_p12 }
  0x1f   :  { %p349_p1 = pnand %p348_p0, %p342_p11 }
  0x21   :  { %352 = shalt.err (!%p349_p1)
}
  0x22   :  { %s385_s0 = smov 64   ;;  %s386_s5 = smov 4  }
  0x23   :  { %45 = dma.hbm_to_vmem [thread:$0]  %s452_s1, 128, %s40_s24, [#allocation9], %s385_s0, %s385_s0, %s386_s5  }
  0x24   :  { %375 = dma.done.wait [#allocation6], 256  }
  0x25   :  { %376 = vsyncadd [#allocation6], 4294967040 }
  0x26   :  { %377 = dma.done.wait [#allocation9], 128  }
  0x27   :  { %378 = vsyncadd [#allocation9], 4294967168  ;;  %v72_v0 = vld [vmem:[#allocation5] sm:$0xff]  ;;  %v73_v1 = vld [vmem:[#allocation5 + $0x8] sm:$0xff]  ;;  %s387_s1 = smov [#allocation10]  }
  0x28   :  { %v78_v2 = vand.u32 2147483647, %v72_v0  ;;  %v79_v3 = vand.u32 2147483647, %v73_v1  ;;  %v287_v14 = vld [vmem:[#allocation8] sm:$0xff]   ;;  %vm90_vm0 = vcmp.ge.f32.partialorder %v72_v0, 0.0 }
  0x29   :  { %v288_v20 = vunpack.c.l.bf16 %v287_v14  ;;  %v289_v22 = vunpack.c.h.bf16 %v287_v14  ;;  %vm91_vm1 = vcmp.ge.f32.partialorder %v73_v1, 0.0  ;;  %v114_v29 = vmax.f32 %v72_v0, 0.0  ;;  %s269_s8 = sshll.u32 %s387_s1, 4  ;;  %s270_s8 = int_to_ptr.vmem [resolvable:$true] %s269_s8 }
  0x2a   :  { %v80_v4 = vsub.f32 0.0, %v78_v2  ;;  %v81_v5 = vsub.f32 0.0, %v79_v3  ;;  %v115_v33 = vmax.f32 %v73_v1, 0.0  ;;  %s353_s9 = scalar_lea.vmem %s270_s8, 384  ;;  %p358_p3 = scmp.lt.s32.totalorder %s270_s8, %s270_s8 }
  0x2b   :  { %p354_p2 = scmp.ne.s32.totalorder %s270_s8, %s353_s9  ;;  %p359_p4 = scmp.lt.s32.totalorder %s353_s9, %s353_s9 }
  0x2c   :  { %v82_v6 = vmul.f32 1.442695, %v80_v4  ;;  %v84_v7 = vmul.f32 1.442695, %v81_v5 }
  0x2d   :  { %p360_p5 = por %p359_p4, %p358_p3 }
  0x2e   :  { %297 = vpow2.f32 %v82_v6 }
  0x2f   :  { %299 = vpow2.f32 %v84_v7  ;;  %p361_p6 = pnand %p360_p5, %p354_p2 }
  0x38   :  { %v298_v8 = vpop.eup %297 }
  0x39   :  { %v300_v9 = vpop.eup %299  ;;  %v86_v10 = vadd.f32 1.0, %v298_v8  ;;  %v99_v12 = vmul.f32 -0.5, %v298_v8  ;;  %v102_v16 = vand.u32 2147483647, %v298_v8 }
  0x3a   :  { %v87_v11 = vadd.f32 1.0, %v300_v9  ;;  %v108_v13 = vmul.f32 -0.5, %v300_v9  ;;  %v111_v18 = vand.u32 2147483647, %v300_v9 }
  0x3b   :  { %301 = vrcp.f32 %v86_v10  ;;  %v100_v15 = vadd.f32 1.0, %v99_v12  ;;  %vm430_vm2 = vcmp.lt.f32.partialorder %v102_v16, 0.0004427343 }
  0x3c   :  { %303 = vrcp.f32 %v87_v11  ;;  %v109_v17 = vadd.f32 1.0, %v108_v13  ;;  %vm112_vm3 = vcmp.lt.f32.partialorder %v111_v18, 0.0004427343 }
  0x3d   :  { %305 = vlog2.f32 %v86_v10  ;;  %v101_v24 = vmul.f32 %v298_v8, %v100_v15 }
  0x3e   :  { %307 = vlog2.f32 %v87_v11  ;;  %v110_v28 = vmul.f32 %v300_v9, %v109_v17 }
  0x45   :  { %v302_v19 = vpop.eup %301 }
  0x46   :  { %v304_v21 = vpop.eup %303  ;;  %v92_v23 = vmul.f32 %v302_v19, %v298_v8 }
  0x47   :  { %v306_v25 = vpop.eup %305  ;;  %v93_v26 = vmul.f32 %v304_v21, %v300_v9 }
  0x48   :  { %v308_v30 = vpop.eup %307  ;;  %v94_v31 = vsel %vm90_vm0, %v302_v19, %v92_v23  ;;  %v98_v32 = vmul.f32 0.6931472, %v306_v25 }
  0x49   :  { %v95_v34 = vsel %vm91_vm1, %v304_v21, %v93_v26  ;;  %v130_v35 = vmul.f32 %v288_v20, %v94_v31  ;;  %v132_v36 = vadd.f32 %v288_v20, %v94_v31  ;;  %v107_v37 = vmul.f32 0.6931472, %v308_v30 }
  0x4a   :  { %v131_v38 = vmul.f32 %v289_v22, %v95_v34  ;;  %v133_v39 = vadd.f32 %v289_v22, %v95_v34  ;;  %v104_v40 = vsel %vm430_vm2, %v101_v24, %v98_v32 }
  0x4b   :  { %v113_v41 = vsel %vm112_vm3, %v110_v28, %v107_v37  ;;  %v116_v42 = vadd.f32 %v114_v29, %v104_v40 }
  0x4c   :  { %v134_v43 = vadd.f32 %v131_v38, %v130_v35  ;;  %v136_v44 = vadd.f32 %v133_v39, %v132_v36  ;;  %v117_v45 = vadd.f32 %v115_v33, %v113_v41 }
  0x4d   :  { %v118_v46 = vsub.f32 %v116_v42, %v72_v0  ;;  %v120_v47 = vmin.f32 %v116_v42, 100.0 }
  0x4e   :  { %257 = vst [vmem:[#allocation10] sm:$0xff] %v134_v43  ;;  %260 = vst [vmem:[#allocation10 + $0x8] sm:$0xff] %v136_v44  ;;  %v119_v48 = vsub.f32 %v117_v45, %v73_v1  ;;  %v121_v49 = vmin.f32 %v117_v45, 100.0 }
  0x4f   :  { %v122_v50 = vmin.f32 %v118_v46, 100.0 }
  0x50   :  { %v123_v51 = vmin.f32 %v119_v48, 100.0 }
  0x51   :  { %v124_v52 = vsub.f32 %v122_v50, %v120_v47 }
  0x52   :  { %v125_v53 = vsub.f32 %v123_v51, %v121_v49 }
  0x53   :  { %v126_v54 = vmul.f32 %v288_v20, %v124_v52 }
  0x54   :  { %v127_v55 = vmul.f32 %v289_v22, %v125_v53 }
  0x55   :  { %v128_v56 = vadd.f32 %v126_v54, %v120_v47 }
  0x56   :  { %v129_v57 = vadd.f32 %v127_v55, %v121_v49 }
  0x58   :  { %v138_v58 = vadd.f32 %v129_v57, %v128_v56 }
  0x5a   :  { %263 = vst [vmem:[#allocation10 + $0x10] sm:$0xff] %v138_v58 }
  0x5b   :  { %364 = shalt.err (!%p361_p6)
}
  0x5c   :  { %s365_s12 = scalar_lea.hbm %s453_s2, 384 }
  0x5d   :  { %p366_p7 = scmp.ne.s32.totalorder %s453_s2, %s365_s12  ;;  %p369_p8 = scmp.lt.u32.totalorder %s365_s12, %s453_s2 }
  0x5f   :  { %p371_p9 = pnand %p369_p8, %p366_p7 }
  0x61   :  { %374 = shalt.err (!%p371_p9)
}
  0x62   :  { %275 = dma.vmem_to_hbm [thread:$0]  %s270_s8, 384, %s453_s2, [#allocation7], %s382_s19, %s382_s19, %s383_s20  }
  0x63   :  { %379 = dma.done.wait [#allocation7], 384  }
  0x64   :  { %380 = vsyncadd [#allocation7], 4294966912 }
  0x65   :  { %279 = vsyncpa [#allocation6], 1 }
  0x66   :  { %280 = vsyncpa [#allocation9], 1 }
  0x67   :  { %281 = vsyncpa [#allocation7], 1 }

</bundles_post_ra>
